<compile_context>
chip_gen: v6e
topology: v6e:2x2x1
jax: 0.10.0
libtpu: 0.0.40
codegen_flags: <defaults>
</compile_context>

<pallas_src>
import jax
import jax.numpy as jnp
from jax.experimental import pallas as pl
from jax.experimental.pallas import tpu as pltpu


def _round_up(n, m):
    return ((n + m - 1) // m) * m


def fcnet_kernel(x_ref,
                 w1_ref, b1_ref,
                 w2_ref, b2_ref,
                 w3_ref, b3_ref,
                 w4_ref, b4_ref,
                 w5_ref, b5_ref,
                 o_ref):
    # x tile: (TB, input_size) f32.  Weights: bf16 (MXU operands).  Biases and
    # all elementwise math: f32.
    def dense(h, w_ref, b_ref):
        return jnp.dot(h.astype(jnp.bfloat16), w_ref[...],
                       preferred_element_type=jnp.float32) + b_ref[...]

    h = jnp.maximum(dense(x_ref[...], w1_ref, b1_ref), 0.0)   # fc1 + relu
    h = jnp.maximum(dense(h, w2_ref, b2_ref), 0.0)            # fc2 + relu
    # dropout1 (p=0.1): identity in eval mode
    h = jnp.maximum(dense(h, w3_ref, b3_ref), 0.0)            # fc3 + relu
    h = jnp.maximum(dense(h, w4_ref, b4_ref), 0.0)            # fc4 + relu
    logits = dense(h, w5_ref, b5_ref)                         # fc5

    # numerically-stable softmax along dim=1 (class axis)
    m = jnp.max(logits, axis=1, keepdims=True)
    e = jnp.exp(logits - m)
    denom = jnp.sum(e, axis=1, keepdims=True)
    o_ref[...] = e * pl.reciprocal(denom, approx=False)


def fcnet_forward(x, params, *, block_batch=256):
    """x: (B, input_size) float32.  params: dict of transposed bf16 weights + f32 biases."""
    B, input_size = x.shape
    num_classes = params["w5t"].shape[1]

    # Batch tile: multiple of 8 sublanes; don't over-pad tiny batches.
    tb = min(block_batch, _round_up(B, 8))
    b_pad = _round_up(B, tb)
    if b_pad != B:
        x = jnp.pad(x, ((0, b_pad - B), (0, 0)))
    grid = (b_pad // tb,)

    weight_args = (
        params["w1t"], params["b1"],
        params["w2t"], params["b2"],
        params["w3t"], params["b3"],
        params["w4t"], params["b4"],
        params["w5t"], params["b5"],
    )

    # Constant index_map => weights/biases DMA'd once, VMEM-resident for all tiles.
    def const_spec(a):
        return pl.BlockSpec(a.shape, lambda i: (0, 0))

    in_specs = [pl.BlockSpec((tb, input_size), lambda i: (i, 0))]
    in_specs += [const_spec(a) for a in weight_args]

    layer_dims = [(input_size, 512), (512, 256), (256, 128),
                  (128, 64), (64, num_classes)]
    flops = 2 * b_pad * sum(m * n for m, n in layer_dims)
    bytes_accessed = (sum(a.size * a.dtype.itemsize for a in weight_args)
                      + x.size * x.dtype.itemsize
                      + b_pad * num_classes * 4)

    out = pl.pallas_call(
        fcnet_kernel,
        out_shape=jax.ShapeDtypeStruct((b_pad, num_classes), jnp.float32),
        grid=grid,
        in_specs=in_specs,
        out_specs=pl.BlockSpec((tb, num_classes), lambda i: (i, 0)),
        compiler_params=pltpu.CompilerParams(
            dimension_semantics=("parallel",)),
        cost_estimate=pl.CostEstimate(
            flops=flops,
            transcendentals=b_pad * num_classes,
            bytes_accessed=bytes_accessed),
    )(x, *weight_args)
    return out[:B]


def init_params(key, input_size, num_classes):
    """PyTorch-style uniform init; weights stored pre-transposed (in, out) in bf16."""
    dims = [(input_size, 512), (512, 256), (256, 128), (128, 64), (64, num_classes)]
    params = {}
    for i, (fan_in, fan_out) in enumerate(dims, start=1):
        key, kw, kb = jax.random.split(key, 3)
        bound = 1.0 / (fan_in ** 0.5)
        w = jax.random.uniform(kw, (fan_in, fan_out), jnp.float32,
                               minval=-bound, maxval=bound)
        params[f"w{i}t"] = w.astype(jnp.bfloat16)   # bf16 weights (bandwidth lever)
        params[f"b{i}"] = jax.random.uniform(kb, (1, fan_out), jnp.float32,
                                             minval=-bound, maxval=bound)
    return params


def reference_forward(x, params):
    """Pure-JAX reference mirroring the kernel's bf16-operand / f32-accum matmuls."""
    h = x
    for i in range(1, 5):
        h = jnp.maximum(
            jnp.dot(h.astype(jnp.bfloat16), params[f"w{i}t"],
                    preferred_element_type=jnp.float32) + params[f"b{i}"], 0.0)
    logits = jnp.dot(h.astype(jnp.bfloat16), params["w5t"],
                     preferred_element_type=jnp.float32) + params["b5"]
    return jax.nn.softmax(logits, axis=1)


if __name__ == "__main__":
    input_size = 32
    num_classes = 8
    batch = 8

    key = jax.random.PRNGKey(0)
    key, kx = jax.random.split(key)
    x = jax.random.normal(kx, (batch, input_size), jnp.float32)
    params = init_params(key, input_size, num_classes)

    out = fcnet_forward(x, params)
    out = jax.block_until_ready(out)

    ref = reference_forward(x, params)
    assert out.shape == (batch, num_classes)
    # bf16 weights => tolerance relaxed vs the original f32-only 1e-5 check.
    assert jnp.allclose(out, ref, atol=2e-3, rtol=0), "mismatch vs reference"
    assert jnp.allclose(jnp.sum(out, axis=1), 1.0, atol=1e-5), "softmax rows must sum to 1"

    print("KERNEL_OK")
</pallas_src>

<mosaic_0001>
module attributes {stable_mosaic.version = 11 : i64} {
  func.func @fcnet_kernel(%arg0: i32, %arg1: memref<8x32xf32, #tpu.memory_space<vmem>>, %arg2: memref<32x512xbf16, #tpu.memory_space<vmem>>, %arg3: memref<1x512xf32, #tpu.memory_space<vmem>>, %arg4: memref<512x256xbf16, #tpu.memory_space<vmem>>, %arg5: memref<1x256xf32, #tpu.memory_space<vmem>>, %arg6: memref<256x128xbf16, #tpu.memory_space<vmem>>, %arg7: memref<1x128xf32, #tpu.memory_space<vmem>>, %arg8: memref<128x64xbf16, #tpu.memory_space<vmem>>, %arg9: memref<1x64xf32, #tpu.memory_space<vmem>>, %arg10: memref<64x8xbf16, #tpu.memory_space<vmem>>, %arg11: memref<1x8xf32, #tpu.memory_space<vmem>>, %arg12: memref<8x8xf32, #tpu.memory_space<vmem>>) attributes {dimension_semantics = [#tpu.dimension_semantics<parallel>], iteration_bounds = array<i64: 1>, scalar_prefetch = 0 : i64, scratch_operands = 0 : i64, tpu.core_type = #tpu.core_type<tc>, window_params = [{transform_indices = @transform_0, window_bounds = array<i64: 8, 32>}, {pipeline_mode = #tpu.pipeline_mode<synchronous>, transform_indices = @transform_1, window_bounds = array<i64: 32, 512>}, {pipeline_mode = #tpu.pipeline_mode<synchronous>, transform_indices = @transform_2, window_bounds = array<i64: 1, 512>}, {pipeline_mode = #tpu.pipeline_mode<synchronous>, transform_indices = @transform_3, window_bounds = array<i64: 512, 256>}, {pipeline_mode = #tpu.pipeline_mode<synchronous>, transform_indices = @transform_4, window_bounds = array<i64: 1, 256>}, {pipeline_mode = #tpu.pipeline_mode<synchronous>, transform_indices = @transform_5, window_bounds = array<i64: 256, 128>}, {pipeline_mode = #tpu.pipeline_mode<synchronous>, transform_indices = @transform_6, window_bounds = array<i64: 1, 128>}, {pipeline_mode = #tpu.pipeline_mode<synchronous>, transform_indices = @transform_7, window_bounds = array<i64: 128, 64>}, {pipeline_mode = #tpu.pipeline_mode<synchronous>, transform_indices = @transform_8, window_bounds = array<i64: 1, 64>}, {pipeline_mode = #tpu.pipeline_mode<synchronous>, transform_indices = @transform_9, window_bounds = array<i64: 64, 8>}, {pipeline_mode = #tpu.pipeline_mode<synchronous>, transform_indices = @transform_10, window_bounds = array<i64: 1, 8>}, {transform_indices = @transform_11, window_bounds = array<i64: 8, 8>}]} {
    %c0 = arith.constant 0 : index
    %c0_0 = arith.constant 0 : index
    %0 = vector.load %arg1[%c0, %c0_0] : memref<8x32xf32, #tpu.memory_space<vmem>>, vector<8x32xf32>
    %1 = arith.truncf %0 : vector<8x32xf32> to vector<8x32xbf16>
    %c0_1 = arith.constant 0 : index
    %c0_2 = arith.constant 0 : index
    %2 = vector.load %arg2[%c0_1, %c0_2] : memref<32x512xbf16, #tpu.memory_space<vmem>>, vector<32x512xbf16>
    %cst = arith.constant dense<0.000000e+00> : vector<8x512xf32>
    %3 = tpu.matmul %1, %2, %cst {dimension_numbers = #tpu.dot_dimension_numbers<[1], [0], [0], [1], [0, 0, 1, 1], [], []>} : vector<8x32xbf16>, vector<32x512xbf16>, vector<8x512xf32> -> vector<8x512xf32>
    %c0_3 = arith.constant 0 : index
    %c0_4 = arith.constant 0 : index
    %4 = vector.load %arg3[%c0_3, %c0_4] : memref<1x512xf32, #tpu.memory_space<vmem>>, vector<1x512xf32>
    %5 = vector.broadcast %4 : vector<1x512xf32> to vector<8x512xf32>
    %6 = arith.addf %3, %5 : vector<8x512xf32>
    %cst_5 = arith.constant 0.000000e+00 : f32
    %7 = vector.broadcast %cst_5 : f32 to vector<8x512xf32>
    %8 = arith.maximumf %6, %7 : vector<8x512xf32>
    %9 = arith.truncf %8 : vector<8x512xf32> to vector<8x512xbf16>
    %c0_6 = arith.constant 0 : index
    %c0_7 = arith.constant 0 : index
    %10 = vector.load %arg4[%c0_6, %c0_7] : memref<512x256xbf16, #tpu.memory_space<vmem>>, vector<512x256xbf16>
    %cst_8 = arith.constant dense<0.000000e+00> : vector<8x256xf32>
    %11 = tpu.matmul %9, %10, %cst_8 {dimension_numbers = #tpu.dot_dimension_numbers<[1], [0], [0], [1], [0, 0, 1, 1], [], []>} : vector<8x512xbf16>, vector<512x256xbf16>, vector<8x256xf32> -> vector<8x256xf32>
    %c0_9 = arith.constant 0 : index
    %c0_10 = arith.constant 0 : index
    %12 = vector.load %arg5[%c0_9, %c0_10] : memref<1x256xf32, #tpu.memory_space<vmem>>, vector<1x256xf32>
    %13 = vector.broadcast %12 : vector<1x256xf32> to vector<8x256xf32>
    %14 = arith.addf %11, %13 : vector<8x256xf32>
    %cst_11 = arith.constant 0.000000e+00 : f32
    %15 = vector.broadcast %cst_11 : f32 to vector<8x256xf32>
    %16 = arith.maximumf %14, %15 : vector<8x256xf32>
    %17 = arith.truncf %16 : vector<8x256xf32> to vector<8x256xbf16>
    %c0_12 = arith.constant 0 : index
    %c0_13 = arith.constant 0 : index
    %18 = vector.load %arg6[%c0_12, %c0_13] : memref<256x128xbf16, #tpu.memory_space<vmem>>, vector<256x128xbf16>
    %cst_14 = arith.constant dense<0.000000e+00> : vector<8x128xf32>
    %19 = tpu.matmul %17, %18, %cst_14 {dimension_numbers = #tpu.dot_dimension_numbers<[1], [0], [0], [1], [0, 0, 1, 1], [], []>} : vector<8x256xbf16>, vector<256x128xbf16>, vector<8x128xf32> -> vector<8x128xf32>
    %c0_15 = arith.constant 0 : index
    %c0_16 = arith.constant 0 : index
    %20 = vector.load %arg7[%c0_15, %c0_16] : memref<1x128xf32, #tpu.memory_space<vmem>>, vector<1x128xf32>
    %21 = vector.broadcast %20 : vector<1x128xf32> to vector<8x128xf32>
    %22 = arith.addf %19, %21 : vector<8x128xf32>
    %cst_17 = arith.constant 0.000000e+00 : f32
    %23 = vector.broadcast %cst_17 : f32 to vector<8x128xf32>
    %24 = arith.maximumf %22, %23 : vector<8x128xf32>
    %25 = arith.truncf %24 : vector<8x128xf32> to vector<8x128xbf16>
    %c0_18 = arith.constant 0 : index
    %c0_19 = arith.constant 0 : index
    %26 = vector.load %arg8[%c0_18, %c0_19] : memref<128x64xbf16, #tpu.memory_space<vmem>>, vector<128x64xbf16>
    %cst_20 = arith.constant dense<0.000000e+00> : vector<8x64xf32>
    %27 = tpu.matmul %25, %26, %cst_20 {dimension_numbers = #tpu.dot_dimension_numbers<[1], [0], [0], [1], [0, 0, 1, 1], [], []>} : vector<8x128xbf16>, vector<128x64xbf16>, vector<8x64xf32> -> vector<8x64xf32>
    %c0_21 = arith.constant 0 : index
    %c0_22 = arith.constant 0 : index
    %28 = vector.load %arg9[%c0_21, %c0_22] : memref<1x64xf32, #tpu.memory_space<vmem>>, vector<1x64xf32>
    %29 = vector.broadcast %28 : vector<1x64xf32> to vector<8x64xf32>
    %30 = arith.addf %27, %29 : vector<8x64xf32>
    %cst_23 = arith.constant 0.000000e+00 : f32
    %31 = vector.broadcast %cst_23 : f32 to vector<8x64xf32>
    %32 = arith.maximumf %30, %31 : vector<8x64xf32>
    %33 = arith.truncf %32 : vector<8x64xf32> to vector<8x64xbf16>
    %c0_24 = arith.constant 0 : index
    %c0_25 = arith.constant 0 : index
    %34 = vector.load %arg10[%c0_24, %c0_25] : memref<64x8xbf16, #tpu.memory_space<vmem>>, vector<64x8xbf16>
    %cst_26 = arith.constant dense<0.000000e+00> : vector<8x8xf32>
    %35 = tpu.matmul %33, %34, %cst_26 {dimension_numbers = #tpu.dot_dimension_numbers<[1], [0], [0], [1], [0, 0, 1, 1], [], []>} : vector<8x64xbf16>, vector<64x8xbf16>, vector<8x8xf32> -> vector<8x8xf32>
    %c0_27 = arith.constant 0 : index
    %c0_28 = arith.constant 0 : index
    %36 = vector.load %arg11[%c0_27, %c0_28] : memref<1x8xf32, #tpu.memory_space<vmem>>, vector<1x8xf32>
    %37 = vector.broadcast %36 : vector<1x8xf32> to vector<8x8xf32>
    %38 = arith.addf %35, %37 : vector<8x8xf32>
    %cst_29 = arith.constant dense<0xFF800000> : vector<8xf32>
    %39 = vector.multi_reduction <maximumf>, %38, %cst_29 [1] : vector<8x8xf32> to vector<8xf32>
    %40 = vector.shape_cast %39 : vector<8xf32> to vector<8x1xf32>
    %41 = vector.broadcast %40 : vector<8x1xf32> to vector<8x8xf32>
    %42 = arith.subf %38, %41 : vector<8x8xf32>
    %43 = math.exp %42 : vector<8x8xf32>
    %cst_30 = arith.constant dense<0.000000e+00> : vector<8xf32>
    %44 = vector.multi_reduction <add>, %43, %cst_30 [1] : vector<8x8xf32> to vector<8xf32>
    %45 = vector.shape_cast %44 : vector<8xf32> to vector<8x1xf32>
    %46 = tpu.reciprocal %45 : vector<8x1xf32> -> vector<8x1xf32>
    %47 = vector.broadcast %46 : vector<8x1xf32> to vector<8x8xf32>
    %48 = arith.mulf %43, %47 : vector<8x8xf32>
    %c0_31 = arith.constant 0 : index
    %c0_32 = arith.constant 0 : index
    %49 = vector.load %arg12[%c0_31, %c0_32] : memref<8x8xf32, #tpu.memory_space<vmem>>, vector<8x8xf32>
    tpu.vector_store %arg12[%c0_31, %c0_32], %48 {strides = array<i32>} : memref<8x8xf32, #tpu.memory_space<vmem>>, vector<8x8xf32>,
    return
  }
  func.func @transform_0(%arg0: i32) -> (i32, i32) {
    %c0_i32 = arith.constant 0 : i32
    %c0_i32_0 = arith.constant 0 : i32
    return %arg0, %c0_i32 : i32, i32
  }
  func.func @transform_1(%arg0: i32) -> (i32, i32) {
    %c0_i32 = arith.constant 0 : i32
    %c0_i32_0 = arith.constant 0 : i32
    %c0_i32_1 = arith.constant 0 : i32
    return %c0_i32, %c0_i32_0 : i32, i32
  }
  func.func @transform_2(%arg0: i32) -> (i32, i32) {
    %c0_i32 = arith.constant 0 : i32
    %c0_i32_0 = arith.constant 0 : i32
    %c0_i32_1 = arith.constant 0 : i32
    return %c0_i32, %c0_i32_0 : i32, i32
  }
  func.func @transform_3(%arg0: i32) -> (i32, i32) {
    %c0_i32 = arith.constant 0 : i32
    %c0_i32_0 = arith.constant 0 : i32
    %c0_i32_1 = arith.constant 0 : i32
    return %c0_i32, %c0_i32_0 : i32, i32
  }
  func.func @transform_4(%arg0: i32) -> (i32, i32) {
    %c0_i32 = arith.constant 0 : i32
    %c0_i32_0 = arith.constant 0 : i32
    %c0_i32_1 = arith.constant 0 : i32
    return %c0_i32, %c0_i32_0 : i32, i32
  }
  func.func @transform_5(%arg0: i32) -> (i32, i32) {
    %c0_i32 = arith.constant 0 : i32
    %c0_i32_0 = arith.constant 0 : i32
    %c0_i32_1 = arith.constant 0 : i32
    return %c0_i32, %c0_i32_0 : i32, i32
  }
  func.func @transform_6(%arg0: i32) -> (i32, i32) {
    %c0_i32 = arith.constant 0 : i32
    %c0_i32_0 = arith.constant 0 : i32
    %c0_i32_1 = arith.constant 0 : i32
    return %c0_i32, %c0_i32_0 : i32, i32
  }
  func.func @transform_7(%arg0: i32) -> (i32, i32) {
    %c0_i32 = arith.constant 0 : i32
    %c0_i32_0 = arith.constant 0 : i32
    %c0_i32_1 = arith.constant 0 : i32
    return %c0_i32, %c0_i32_0 : i32, i32
  }
  func.func @transform_8(%arg0: i32) -> (i32, i32) {
    %c0_i32 = arith.constant 0 : i32
    %c0_i32_0 = arith.constant 0 : i32
    %c0_i32_1 = arith.constant 0 : i32
    return %c0_i32, %c0_i32_0 : i32, i32
  }
  func.func @transform_9(%arg0: i32) -> (i32, i32) {
    %c0_i32 = arith.constant 0 : i32
    %c0_i32_0 = arith.constant 0 : i32
    %c0_i32_1 = arith.constant 0 : i32
    return %c0_i32, %c0_i32_0 : i32, i32
  }
  func.func @transform_10(%arg0: i32) -> (i32, i32) {
    %c0_i32 = arith.constant 0 : i32
    %c0_i32_0 = arith.constant 0 : i32
    %c0_i32_1 = arith.constant 0 : i32
    return %c0_i32, %c0_i32_0 : i32, i32
  }
  func.func @transform_11(%arg0: i32) -> (i32, i32) {
    %c0_i32 = arith.constant 0 : i32
    %c0_i32_0 = arith.constant 0 : i32
    return %arg0, %c0_i32 : i32, i32
  }
}

</mosaic_0001>

<bundles_post_ra>
// kernel: tpu_custom_call.1
= control target key start
LH: loop header
LB: loop body
LE: loop exit
PB: predicated region body
PF: predicated region fallthrough
CT: control target
= control target key end

     0   :  { %16 = vsyncpa [#allocation3], 0  ;;  %s1792_s0 = inlined_call_operand.vmem [shape: f32[8,32], index: 0, kind: input, shape index: {}]   ;;  %s1793_s1 = inlined_call_operand.hbm [shape: bf16[32,512], index: 1, kind: input, shape index: {}]   ;;  %s1794_s2 = inlined_call_operand.hbm [shape: f32[1,512], index: 2, kind: input, shape index: {}]   ;;  %s1795_s3 = inlined_call_operand.hbm [shape: bf16[512,256], index: 3, kind: input, shape index: {}]   ;;  %s1796_s4 = inlined_call_operand.vmem [shape: f32[1,256], index: 4, kind: input, shape index: {}]   ;;  %s1797_s5 = inlined_call_operand.vmem [shape: bf16[256,128], index: 5, kind: input, shape index: {}]   ;;  %s1798_s6 = inlined_call_operand.hbm [shape: f32[1,128], index: 6, kind: input, shape index: {}]   ;;  %s1799_s7 = inlined_call_operand.vmem [shape: bf16[128,64], index: 7, kind: input, shape index: {}]   ;;  %s1800_s8 = inlined_call_operand.vmem [shape: f32[1,64], index: 8, kind: input, shape index: {}]   ;;  %s1801_s9 = inlined_call_operand.vmem [shape: bf16[64,8], index: 9, kind: input, shape index: {}]   ;;  %s1802_s10 = inlined_call_operand.vmem [shape: f32[1,8], index: 10, kind: input, shape index: {}]   ;;  %s1803_s11 = inlined_call_operand.hbm [shape: f32[8,8], index: 11, kind: output, shape index: {}]  }
   0x1   :  { %17 = vsyncpa [#allocation6], 0 }
   0x2   :  { %18 = vsyncpa [#allocation9], 0 }
   0x3   :  { %19 = vsyncpa [#allocation4], 0  ;;  %s1576_s17 = smov [#allocation5]   ;;  %s1577_s19 = smov [#allocation2]  }
   0x4   :  { %s40_s18 = sshll.u32 %s1576_s17, 4  ;;  %s27_s20 = sshll.u32 %s1577_s19, 4  ;;  %s41_s18 = int_to_ptr.vmem [resolvable:$true] %s40_s18  ;;  %s28_s20 = int_to_ptr.vmem [resolvable:$true] %s27_s20 }
   0x5   :  { %s1476_s21 = scalar_lea.vmem %s41_s18, 64  ;;  %p1481_p1 = scmp.lt.s32.totalorder %s41_s18, %s41_s18 }
   0x6   :  { %p1477_p0 = scmp.ne.s32.totalorder %s41_s18, %s1476_s21  ;;  %p1482_p2 = scmp.lt.s32.totalorder %s1476_s21, %s1476_s21 }
   0x8   :  { %p1483_p3 = por %p1482_p2, %p1481_p1 }
   0xa   :  { %p1484_p4 = pnand %p1483_p3, %p1477_p0 }
   0xc   :  { %1487 = shalt.err (!%p1484_p4)
}
   0xd   :  { %43 = dma.hbm_to_vmem [thread:$0]  %s1794_s2, 64, %s41_s18, [#allocation6]  }
   0xe   :  { %s1496_s24 = scalar_lea.vmem %s28_s20, 1024  ;;  %p1501_p6 = scmp.lt.s32.totalorder %s28_s20, %s28_s20 }
   0xf   :  { %p1497_p5 = scmp.ne.s32.totalorder %s28_s20, %s1496_s24  ;;  %p1502_p7 = scmp.lt.s32.totalorder %s1496_s24, %s1496_s24 }
  0x11   :  { %p1503_p8 = por %p1502_p7, %p1501_p6 }
  0x13   :  { %p1504_p9 = pnand %p1503_p8, %p1497_p5 }
  0x15   :  { %1507 = shalt.err (!%p1504_p9)
}
  0x16   :  { %s1578_s25 = smov 256   ;;  %s1579_s26 = smov 16  }
  0x17   :  { %33 = dma.hbm_to_vmem [thread:$0]  %s1793_s1, 1024, %s28_s20, [#allocation3], %s1578_s25, %s1578_s25, %s1579_s26  }
  0x18   :  { %s1580_s29 = smov [#allocation7]  }
  0x19   :  { %s49_s30 = sshll.u32 %s1580_s29, 4  ;;  %s50_s30 = int_to_ptr.vmem [resolvable:$true] %s49_s30 }
  0x1a   :  { %s1516_s12 = scalar_lea.vmem %s50_s30, 8192  ;;  %p1521_p11 = scmp.lt.s32.totalorder %s50_s30, %s50_s30 }
  0x1b   :  { %p1517_p10 = scmp.ne.s32.totalorder %s50_s30, %s1516_s12  ;;  %p1522_p12 = scmp.lt.s32.totalorder %s1516_s12, %s1516_s12 }
  0x1d   :  { %p1523_p13 = por %p1522_p12, %p1521_p11 }
  0x1f   :  { %p1524_p0 = pnand %p1523_p13, %p1517_p10 }
  0x21   :  { %1527 = shalt.err (!%p1524_p0)
}
  0x22   :  { %s1581_s2 = smov 128   ;;  %s1582_s13 = smov 8  }
  0x23   :  { %55 = dma.hbm_to_vmem [thread:$0]  %s1795_s3, 8192, %s50_s30, [#allocation6], %s1581_s2, %s1581_s2, %s1582_s13  }
  0x24   :  { %s1583_s16 = smov [#allocation8]  }
  0x25   :  { %s66_s17 = sshll.u32 %s1583_s16, 4  ;;  %s67_s17 = int_to_ptr.vmem [resolvable:$true] %s66_s17 }
  0x26   :  { %s1536_s1 = scalar_lea.vmem %s67_s17, 16  ;;  %s1540_s18 = scalar_lea.vmem %s67_s17, 32 }
  0x27   :  { %p1537_p1 = scmp.ne.s32.totalorder %s67_s17, %s1536_s1  ;;  %p1541_p2 = scmp.lt.s32.totalorder %s67_s17, %s67_s17 }
  0x28   :  { %p1542_p3 = scmp.lt.s32.totalorder %s1540_s18, %s1536_s1 }
  0x2a   :  { %p1543_p4 = por %p1542_p3, %p1541_p2 }
  0x2c   :  { %p1544_p5 = pnand %p1543_p4, %p1537_p1 }
  0x2e   :  { %1547 = shalt.err (!%p1544_p5)
}
  0x2f   :  { %69 = dma.hbm_to_vmem [thread:$0]  %s1798_s6, 16, %s67_s17, [#allocation9]  }
  0x30   :  { %1568 = dma.done.wait [#allocation3], 1024  }
  0x31   :  { %1569 = vsyncadd [#allocation3], 4294966272 }
  0x32   :  { %1570 = dma.done.wait [#allocation6], 8256  }
  0x33   :  { %1571 = vsyncadd [#allocation6], 4294959040 }
  0x34   :  { %1572 = dma.done.wait [#allocation9], 16  }
  0x35   :  { %1573 = vsyncadd [#allocation9], 4294967280  ;;  %v1584_v0 = vmov 0   ;;  %v1328_v1 = vld [vmem:[#allocation2 + $0x24] ss:$16 sps:$4 sm:$0xff]   ;;  %vm163_vm0 = vcmask 261120  }
  0x36   :  { %199 = vmatprep.mubr.bf16.mxu1 %v1584_v0  ;;  %v1330_v2 = vld [vmem:[#allocation2 + $0x20] ss:$16 sps:$4 sm:$0xff]   ;;  %179 = vmatprep.subr.bf16.mxu1 %v1328_v1  ;;  %v1331_v3 = vld [vmem:[#allocation2 + $0x4] ss:$16 sps:$4 sm:$0xff]   ;;  %v1336_v6 = vld [vmem:[#allocation2 + $0x2c] ss:$16 sps:$4 sm:$0xff]  }
  0x37   :  { %v1333_v4 = vld [vmem:[#allocation2] ss:$16 sps:$4 sm:$0xff]   ;;  %180 = vmatpush1.bf16.msra.mxu1 %v1330_v2  ;;  %v1334_v7 = vld [vmem:[#allocation2 + $0x28] ss:$16 sps:$4 sm:$0xff]   ;;  %v1342_v10 = vld [vmem:[#allocation7 + $0x70] ss:$8 sps:$4 sm:$0xff]  }
  0x38   :  { %v91_v5 = vld [vmem:[%s1792_s0] sm:$0xff]  ;;  %181 = vmatprep.subr.bf16.mxu1 %v1331_v3  ;;  %v1343_v11 = vld [vmem:[#allocation7 + $0x64] ss:$8 sps:$4 sm:$0xff]   ;;  %v1339_v12 = vld [vmem:[#allocation2 + $0xc] ss:$16 sps:$4 sm:$0xff]   ;;  %vm1586_vm1 = vmmov 0  }
  0x39   :  { %v92_v8 = vpack.c.bf16 %v91_v5, %v91_v5  ;;  %v1340_v9 = vld [vmem:[#allocation7 + $0x74] ss:$8 sps:$4 sm:$0xff]   ;;  %v1345_v13 = vld [vmem:[#allocation7 + $0x60] ss:$8 sps:$4 sm:$0xff]   ;;  %v1351_v17 = vld [vmem:[#allocation7 + $0x50] ss:$8 sps:$4 sm:$0xff]  }
  0x3a   :  { %653 = vmatprep.subr.bf16.mxu0 %v1340_v9  ;;  %v1346_v14 = vld [vmem:[#allocation7 + $0x54] ss:$8 sps:$4 sm:$0xff]   ;;  %v1352_v18 = vld [vmem:[#allocation7 + $0x44] ss:$8 sps:$4 sm:$0xff]   ;;  %v1348_v19 = vld [vmem:[#allocation7 + $0x170] ss:$8 sps:$4 sm:$0xff]  }
  0x3b   :  { %182 = vmatpush1.bf16.msra.mxu1 %v1333_v4  ;;  %654 = vmatpush1.bf16.msra.mxu0 %v1342_v10  ;;  %v1337_v15 = vld [vmem:[#allocation2 + $0x8] ss:$16 sps:$4 sm:$0xff]   ;;  %v1357_v21 = vld [vmem:[#allocation7 + $0x40] ss:$8 sps:$4 sm:$0xff]   ;;  %v1363_v25 = vld [vmem:[#allocation7 + $0x30] ss:$8 sps:$4 sm:$0xff]  }
  0x3c   :  { %220 = vmatprep.subr.bf16.mxu1 %v1336_v6  ;;  %655 = vmatprep.subr.bf16.mxu0 %v1343_v11  ;;  %v1350_v16 = vld [vmem:[#allocation7 + $0x174] ss:$8 sps:$4 sm:$0xff]   ;;  %v1356_v20 = vld [vmem:[#allocation7 + $0x164] ss:$8 sps:$4 sm:$0xff]   ;;  %v1354_v23 = vld [vmem:[#allocation7 + $0x160] ss:$8 sps:$4 sm:$0xff]  }
  0x3d   :  { %v1358_v22 = vld [vmem:[#allocation7 + $0x34] ss:$8 sps:$4 sm:$0xff]   ;;  %v1364_v26 = vld [vmem:[#allocation7 + $0x24] ss:$8 sps:$4 sm:$0xff]   ;;  %v1360_v27 = vld [vmem:[#allocation7 + $0x150] ss:$8 sps:$4 sm:$0xff]  }
  0x3e   :  { %1150 = vmatmul.mubr.msk.bf16.vlgmr.msra.gmra.mxu1 %vm163_vm0, %v92_v8  ;;  %v1362_v24 = vld [vmem:[#allocation7 + $0x154] ss:$8 sps:$4 sm:$0xff]   ;;  %v1368_v28 = vld [vmem:[#allocation7 + $0x144] ss:$8 sps:$4 sm:$0xff]   ;;  %v1369_v29 = vld [vmem:[#allocation7 + $0x20] ss:$8 sps:$4 sm:$0xff]  }
  0x3f   :  { %221 = vmatpush1.bf16.msra.mxu1 %v1334_v7  ;;  %240 = vmatprep.mubr.bf16.mxu1 %v1584_v0  ;;  %v1370_v30 = vld [vmem:[#allocation7 + $0x14] ss:$8 sps:$4 sm:$0xff]   ;;  %v1366_v31 = vld [vmem:[#allocation7 + $0x140] ss:$8 sps:$4 sm:$0xff]   ;;  %v1375_v33 = vld [vmem:[#allocation7 + $0x10] ss:$8 sps:$4 sm:$0xff]  }
  0x40   :  { %222 = vmatprep.subr.bf16.mxu1 %v1339_v12  ;;  %656 = vmatpush1.bf16.msra.mxu0 %v1345_v13  ;;  %v1374_v32 = vld [vmem:[#allocation7 + $0x134] ss:$8 sps:$4 sm:$0xff]   ;;  %v1376_v34 = vld [vmem:[#allocation7 + $0x4] ss:$8 sps:$4 sm:$0xff]   ;;  %v1372_v35 = vld [vmem:[#allocation7 + $0x130] ss:$8 sps:$4 sm:$0xff]   ;;  %v103_v12 = vlaneseq }
  0x41   :  { %657 = vmatprep.subr.bf16.mxu0 %v1346_v14  ;;  %v1380_v36 = vld [vmem:[#allocation7 + $0x124] ss:$8 sps:$4 sm:$0xff]   ;;  %v1381_v37 = vld [vmem:[#allocation7] ss:$8 sps:$4 sm:$0xff]   ;;  %v1382_v38 = vld [vmem:[#allocation7 + $0xf4] ss:$8 sps:$4 sm:$0xff]  }
  0x42   :  { %v1378_v39 = vld [vmem:[#allocation7 + $0x120] ss:$8 sps:$4 sm:$0xff]   ;;  %v1386_v40 = vld [vmem:[#allocation7 + $0x114] ss:$8 sps:$4 sm:$0xff]   ;;  %v1387_v41 = vld [vmem:[#allocation7 + $0xf0] ss:$8 sps:$4 sm:$0xff]  }
  0x43   :  { %223 = vmatpush1.bf16.msra.mxu1 %v1337_v15  ;;  %v1388_v42 = vld [vmem:[#allocation7 + $0xe4] ss:$8 sps:$4 sm:$0xff]   ;;  %v1384_v43 = vld [vmem:[#allocation7 + $0x110] ss:$8 sps:$4 sm:$0xff]   ;;  %v1393_v45 = vld [vmem:[#allocation7 + $0xe0] ss:$8 sps:$4 sm:$0xff]  }
  0x44   :  { %694 = vmatprep.subr.bf16.mxu1 %v1350_v16  ;;  %658 = vmatpush1.bf16.msra.mxu0 %v1351_v17  ;;  %v1392_v44 = vld [vmem:[#allocation7 + $0x104] ss:$8 sps:$4 sm:$0xff]   ;;  %v1394_v46 = vld [vmem:[#allocation7 + $0xd4] ss:$8 sps:$4 sm:$0xff]   ;;  %v1390_v47 = vld [vmem:[#allocation7 + $0x100] ss:$8 sps:$4 sm:$0xff]  }
  0x45   :  { %659 = vmatprep.subr.bf16.mxu0 %v1352_v18  ;;  %v1398_v48 = vld [vmem:[#allocation7 + $0x1f4] ss:$8 sps:$4 sm:$0xff]   ;;  %v1399_v49 = vld [vmem:[#allocation7 + $0xd0] ss:$8 sps:$4 sm:$0xff]   ;;  %v1400_v50 = vld [vmem:[#allocation7 + $0xc4] ss:$8 sps:$4 sm:$0xff]  }
  0x46   :  { %1151 = vmatmul.mubr.msk.bf16.vlgmr.msra.gmra.mxu1 %vm163_vm0, %v92_v8  ;;  %v1396_v51 = vld [vmem:[#allocation7 + $0x1f0] ss:$8 sps:$4 sm:$0xff]   ;;  %v1404_v52 = vld [vmem:[#allocation7 + $0x1e4] ss:$8 sps:$4 sm:$0xff]   ;;  %v1405_v53 = vld [vmem:[#allocation7 + $0xc0] ss:$8 sps:$4 sm:$0xff]  }
  0x47   :  { %695 = vmatpush1.bf16.msra.mxu1 %v1348_v19  ;;  %v1406_v54 = vld [vmem:[#allocation7 + $0xb4] ss:$8 sps:$4 sm:$0xff]   ;;  %v1402_v55 = vld [vmem:[#allocation7 + $0x1e0] ss:$8 sps:$4 sm:$0xff]   ;;  %v1411_v57 = vld [vmem:[#allocation7 + $0xb0] ss:$8 sps:$4 sm:$0xff]  }
  0x48   :  { %696 = vmatprep.subr.bf16.mxu1 %v1356_v20  ;;  %660 = vmatpush1.bf16.msra.mxu0 %v1357_v21  ;;  %v1410_v56 = vld [vmem:[#allocation7 + $0x1d4] ss:$8 sps:$4 sm:$0xff]   ;;  %v1412_v58 = vld [vmem:[#allocation7 + $0xa4] ss:$8 sps:$4 sm:$0xff]   ;;  %v1408_v59 = vld [vmem:[#allocation7 + $0x1d0] ss:$8 sps:$4 sm:$0xff]  }
  0x49   :  { %661 = vmatprep.subr.bf16.mxu0 %v1358_v22  ;;  %v1416_v60 = vld [vmem:[#allocation7 + $0x1c4] ss:$8 sps:$4 sm:$0xff]   ;;  %v1417_v61 = vld [vmem:[#allocation7 + $0xa0] ss:$8 sps:$4 sm:$0xff]   ;;  %v1418_v63 = vld [vmem:[#allocation7 + $0x94] ss:$8 sps:$4 sm:$0xff]  }
  0x4a   :  { %v1414_v62 = vld [vmem:[#allocation7 + $0x1c0] ss:$8 sps:$4 sm:$0xff]   ;;  %v1422_v0 = vld [vmem:[#allocation7 + $0x1b4] ss:$8 sps:$4 sm:$0xff]   ;;  %v1420_v1 = vld [vmem:[#allocation7 + $0x1b0] ss:$8 sps:$4 sm:$0xff]  }
  0x4b   :  { %697 = vmatpush1.bf16.msra.mxu1 %v1354_v23  ;;  %v1423_v2 = vld [vmem:[#allocation7 + $0x90] ss:$8 sps:$4 sm:$0xff]   ;;  %v1424_v3 = vld [vmem:[#allocation7 + $0x84] ss:$8 sps:$4 sm:$0xff]   ;;  %v1426_v5 = vld [vmem:[#allocation7 + $0x1a0] ss:$8 sps:$4 sm:$0xff]  }
  0x4c   :  { %698 = vmatprep.subr.bf16.mxu1 %v1362_v24  ;;  %662 = vmatpush1.bf16.msra.mxu0 %v1363_v25  ;;  %v1428_v4 = vld [vmem:[#allocation7 + $0x1a4] ss:$8 sps:$4 sm:$0xff]   ;;  %v1429_v6 = vld [vmem:[#allocation7 + $0x80] ss:$8 sps:$4 sm:$0xff]   ;;  %v1432_v7 = vld [vmem:[#allocation7 + $0x194] ss:$8 sps:$4 sm:$0xff]  }
  0x4d   :  { %663 = vmatprep.subr.bf16.mxu0 %v1364_v26  ;;  %v1430_v8 = vld [vmem:[#allocation7 + $0x190] ss:$8 sps:$4 sm:$0xff]   ;;  %v1435_v9 = vld [vmem:[#allocation7 + $0x184] ss:$8 sps:$4 sm:$0xff]   ;;  %v1433_v10 = vld [vmem:[#allocation7 + $0x180] ss:$8 sps:$4 sm:$0xff]  }
  0x4e   :  { %v1436_v11 = vld [vmem:[%s1797_s5 + $0x78] sm:$0xff]   ;;  %v1668_v13 = vshrl.u32 %v103_v12, 7  ;;  %v101_v15 = vld [vmem:[#allocation5] sm:$0xf]  ;;  %vm1068_vm2 = vcmask 523264   ;;  %vm1112_vm3 = vcmask 64512  }
  0x4f   :  { %699 = vmatpush1.bf16.msra.mxu1 %v1360_v27 }
  0x50   :  { %700 = vmatprep.subr.bf16.mxu1 %v1368_v28  ;;  %664 = vmatpush1.bf16.msra.mxu0 %v1369_v29  ;;  %v105_v14 = vsub.s32 0, %v1668_v13  ;;  %v109_v16 = vsub.s32 1, %v1668_v13  ;;  %v113_v21 = vsub.s32 2, %v1668_v13  ;;  %v117_v24 = vsub.s32 3, %v1668_v13  ;;  %v1457_v13 = vld [vmem:[%s1799_s7 + $0x10] sm:$0xff]  }
  0x51   :  { %665 = vmatprep.subr.bf16.mxu0 %v1370_v30 }
  0x52   :  { %v106_v17 = vrot.slane %v101_v15, %v105_v14  ;;  %v110_v18 = vrot.slane %v101_v15, %v109_v16  ;;  %v114_v27 = vrot.slane %v101_v15, %v113_v21 }
  0x53   :  { %701 = vmatpush1.bf16.msra.mxu1 %v1366_v31  ;;  %v118_v31 = vrot.slane %v101_v15, %v117_v24 }
  0x54   :  { %702 = vmatprep.subr.bf16.mxu1 %v1374_v32  ;;  %666 = vmatpush1.bf16.msra.mxu0 %v1375_v33  ;;  %v1437_v32 = vld [vmem:[%s1797_s5 + $0x38] sm:$0xff]  }
  0x55   :  { %667 = vmatprep.subr.bf16.mxu0 %v1376_v34 }
  0x57   :  { %703 = vmatpush1.bf16.msra.mxu1 %v1372_v35  ;;  %v1438_v35 = vld [vmem:[%s1797_s5 + $0x70] sm:$0xff]  }
  0x58   :  { %704 = vmatprep.subr.bf16.mxu1 %v1380_v36  ;;  %668 = vmatpush1.bf16.msra.mxu0 %v1381_v37 }
  0x59   :  { %669 = vmatprep.subr.bf16.mxu0 %v1382_v38 }
  0x5b   :  { %705 = vmatpush1.bf16.msra.mxu1 %v1378_v39  ;;  %v1439_v39 = vld [vmem:[%s1797_s5 + $0x30] sm:$0xff]  }
  0x5c   :  { %706 = vmatprep.subr.bf16.mxu1 %v1386_v40  ;;  %670 = vmatpush2.bf16.msra.mxu0 %v1387_v41 }
  0x5d   :  { %671 = vmatprep.subr.bf16.mxu0 %v1388_v42  ;;  %v1440_v42 = vld [vmem:[%s1797_s5 + $0x68] sm:$0xff]  }
  0x5f   :  { %707 = vmatpush1.bf16.msra.mxu1 %v1384_v43 }
  0x60   :  { %708 = vmatprep.subr.bf16.mxu1 %v1392_v44  ;;  %672 = vmatpush2.bf16.msra.mxu0 %v1393_v45 }
  0x61   :  { %673 = vmatprep.subr.bf16.mxu0 %v1394_v46  ;;  %v1441_v46 = vld [vmem:[%s1797_s5 + $0x28] sm:$0xff]  }
  0x63   :  { %709 = vmatpush1.bf16.msra.mxu1 %v1390_v47 }
  0x64   :  { %710 = vmatprep.subr.bf16.mxu1 %v1398_v48  ;;  %674 = vmatpush2.bf16.msra.mxu0 %v1399_v49  ;;  %v1442_v48 = vld [vmem:[%s1797_s5 + $0x60] sm:$0xff]  }
  0x65   :  { %675 = vmatprep.subr.bf16.mxu0 %v1400_v50  ;;  %v1443_v49 = vld [vmem:[%s1797_s5 + $0x20] sm:$0xff]   ;;  %v1444_v50 = vld [vmem:[%s1797_s5 + $0x58] sm:$0xff]  }
  0x67   :  { %711 = vmatpush2.bf16.msra.mxu1 %v1396_v51  ;;  %v1445_v51 = vld [vmem:[%s1797_s5 + $0x18] sm:$0xff]  }
  0x68   :  { %712 = vmatprep.subr.bf16.mxu1 %v1404_v52  ;;  %676 = vmatpush2.bf16.msra.mxu0 %v1405_v53  ;;  %v1446_v52 = vld [vmem:[%s1797_s5 + $0x50] sm:$0xff]  }
  0x69   :  { %677 = vmatprep.subr.bf16.mxu0 %v1406_v54  ;;  %v1447_v53 = vld [vmem:[%s1797_s5 + $0x10] sm:$0xff]   ;;  %v1448_v54 = vld [vmem:[%s1797_s5 + $0x48] sm:$0xff]  }
  0x6b   :  { %713 = vmatpush2.bf16.msra.mxu1 %v1402_v55  ;;  %v1449_v55 = vld [vmem:[%s1797_s5 + $0x8] sm:$0xff]  }
  0x6c   :  { %714 = vmatprep.subr.bf16.mxu1 %v1410_v56  ;;  %678 = vmatpush2.bf16.msra.mxu0 %v1411_v57  ;;  %v1450_v56 = vld [vmem:[%s1797_s5 + $0x40] sm:$0xff]  }
  0x6d   :  { %679 = vmatprep.subr.bf16.mxu0 %v1412_v58  ;;  %v1451_v57 = vld [vmem:[%s1797_s5] sm:$0xff]   ;;  %v1452_v58 = vld [vmem:[%s1799_s7 + $0x38] sm:$0xff]  }
  0x6f   :  { %715 = vmatpush2.bf16.msra.mxu1 %v1408_v59  ;;  %v1585_v59 = vmov 0.0  }
  0x70   :  { %716 = vmatprep.subr.bf16.mxu1 %v1416_v60  ;;  %680 = vmatpush2.bf16.msra.mxu0 %v1417_v61  ;;  %v1453_v60 = vld [vmem:[%s1799_s7 + $0x30] sm:$0xff]   ;;  %v1454_v61 = vld [vmem:[%s1799_s7 + $0x28] sm:$0xff]  }
  0x71   :  { %681 = vmatprep.subr.bf16.mxu0 %v1418_v63  ;;  %v1456_v63 = vld [vmem:[%s1799_s7 + $0x18] sm:$0xff]  }
  0x73   :  { %717 = vmatpush2.bf16.msra.mxu1 %v1414_v62  ;;  %v1455_v62 = vld [vmem:[%s1799_s7 + $0x20] sm:$0xff]  }
  0x74   :  { %718 = vmatprep.subr.bf16.mxu1 %v1422_v0  ;;  %682 = vmatpush2.bf16.msra.mxu0 %v1423_v2  ;;  %v321_v0 = vld [vmem:[%s1796_s4] sm:$0x3] }
  0x75   :  { %683 = vmatprep.subr.bf16.mxu0 %v1424_v3  ;;  %v326_v3 = vrot.slane %v321_v0, %v105_v14  ;;  %v1458_v14 = vld [vmem:[%s1799_s7 + $0x8] sm:$0xff]  }
  0x77   :  { %719 = vmatpush2.bf16.msra.mxu1 %v1420_v1 }
  0x78   :  { %720 = vmatprep.subr.bf16.mxu1 %v1428_v4  ;;  %684 = vmatpush2.bf16.msra.mxu0 %v1429_v6 }
  0x79   :  { %1248 = vmatprep.subr.bf16.mxu0 %v1436_v11 }
  0x7b   :  { %721 = vmatpush2.bf16.msra.mxu1 %v1426_v5  ;;  %v330_v5 = vrot.slane %v321_v0, %v109_v16  ;;  %v1459_v16 = vld [vmem:[%s1799_s7] sm:$0xff]  }
  0x7c   :  { %722 = vmatprep.subr.bf16.mxu1 %v1432_v7 }
  0x7f   :  { %723 = vmatpush2.bf16.msra.mxu1 %v1430_v8 }
  0x80   :  { %724 = vmatprep.subr.bf16.mxu1 %v1435_v9 }
  0x83   :  { %725 = vmatpush2.bf16.msra.mxu1 %v1433_v10 }
  0x84   :  { %1284 = vmatprep.subr.bf16.mxu1 %v1585_v59 }
  0xfe   :  { %v201_v19 = vpop.f32.mrf.mxu1 }
  0xff   :  { %v202_v20 = vadd.f32 %v201_v19, %v106_v17 }
 0x100   :  { %v203_v22 = vpop.f32.mrf.mxu1 }
 0x101   :  { %v204_v23 = vadd.f32 %v203_v22, %v110_v18  ;;  %v249_v25 = vmax.f32 %v202_v20, 0.0  ;;  %v1460_v22 = vld [vmem:[%s1801_s9 + $0x18] sm:$0xff]  }
 0x102   :  { %v205_v26 = vpop.f32.mrf.mxu1 }
 0x103   :  { %v250_v28 = vmax.f32 %v204_v23, 0.0  ;;  %v253_v33 = vpack.c.bf16 %v249_v25, %v249_v25  ;;  %v1461_v23 = vld [vmem:[%s1801_s9 + $0x10] sm:$0xff]   ;;  %v1216_v25 = vld [vmem:[#allocation8] ss:$0 sm:$0xff] }
 0x104   :  { %v206_v29 = vpop.f32.mrf.mxu1 }
 0x105   :  { %v254_v30 = vpack.c.bf16 %v250_v28, %v250_v28 }
 0x106   :  { %v242_v34 = vpop.f32.mrf.mxu1 }
 0x107   :  { %v243_v36 = vadd.f32 %v242_v34, %v114_v27  ;;  %685 = vmatprep.mubr.bf16.mxu0 %v254_v30  ;;  %v1463_v34 = vld [vmem:[%s1801_s9] sm:$0xff]  }
 0x108   :  { %v244_v37 = vpop.f32.mrf.mxu1  ;;  %686 = vmatmul.mubr.bf16.vlgmr.msra.gmra.mxu0 %v253_v33  ;;  %v1462_v33 = vld [vmem:[%s1801_s9 + $0x8] sm:$0xff]  }
 0x109   :  { %v245_v38 = vadd.f32 %v244_v37, %v118_v31  ;;  %1249 = vmatpush3.bf16.msra.mxu0 %v1437_v32  ;;  %v251_v40 = vmax.f32 %v243_v36, 0.0 }
 0x10a   :  { %v246_v41 = vpop.f32.mrf.mxu1  ;;  %1250 = vmatprep.subr.bf16.mxu0 %v1438_v35  ;;  %v1233_v35 = vld [vmem:[%s1800_s8] ss:$0 sm:$0xff]  ;;  %s1587_s8 = smov [#allocation10]  }
 0x10b   :  { %v252_v43 = vmax.f32 %v245_v38, 0.0  ;;  %v255_v47 = vpack.c.bf16 %v251_v40, %v251_v40  ;;  %s1131_s9 = sshll.u32 %s1587_s8, 4  ;;  %s1132_s9 = int_to_ptr.vmem [resolvable:$true] %s1131_s9 }
 0x10c   :  { %v247_v44 = vpop.f32.mrf.mxu1  ;;  %p1553_p7 = scmp.lt.s32.totalorder %s1132_s9, %s1132_s9 }
 0x10d   :  { %v256_v45 = vpack.c.bf16 %v252_v43, %v252_v43  ;;  %1251 = vmatpush3.bf16.msra.mxu0 %v1439_v39  ;;  %v1242_v43 = vld [vmem:[%s1802_s10] ss:$0 sm:$0xff]  ;;  %s1548_s10 = scalar_lea.vmem %s1132_s9, 128 }
 0x10e   :  { %1252 = vmatprep.subr.bf16.mxu0 %v1440_v42  ;;  %p1549_p6 = scmp.ne.s32.totalorder %s1132_s9, %s1548_s10  ;;  %p1554_p8 = scmp.lt.s32.totalorder %s1548_s10, %s1548_s10 }
 0x10f   :  { %726 = vmatprep.mubr.bf16.mxu1 %v256_v45 }
 0x110   :  { %727 = vmatmul.mubr.bf16.vlgmr.msra.gmra.mxu1 %v255_v47  ;;  %p1555_p9 = por %p1554_p8, %p1553_p7 }
 0x111   :  { %1253 = vmatpush3.bf16.msra.mxu0 %v1441_v46  ;;  %1285 = vmatpush3.bf16.msra.mxu1 %v1452_v58 }
 0x112   :  { %1254 = vmatprep.subr.bf16.mxu0 %v1442_v48  ;;  %1286 = vmatprep.subr.bf16.mxu1 %v1585_v59  ;;  %p1556_p10 = pnand %p1555_p9, %p1549_p6 }
 0x113   :  { %1300 = vmatprep.mubr.msk.bf16.mxu1 %vm1586_vm1, %v1585_v59 }
 0x115   :  { %1255 = vmatpush3.bf16.msra.mxu0 %v1443_v49  ;;  %1287 = vmatpush3.bf16.msra.mxu1 %v1453_v60 }
 0x116   :  { %1256 = vmatprep.subr.bf16.mxu0 %v1444_v50  ;;  %1288 = vmatprep.subr.bf16.mxu1 %v1585_v59 }
 0x119   :  { %1257 = vmatpush3.bf16.msra.mxu0 %v1445_v51  ;;  %1289 = vmatpush3.bf16.msra.mxu1 %v1454_v61 }
 0x11a   :  { %1258 = vmatprep.subr.bf16.mxu0 %v1446_v52  ;;  %1290 = vmatprep.subr.bf16.mxu1 %v1585_v59 }
 0x11d   :  { %1259 = vmatpush3.bf16.msra.mxu0 %v1447_v53  ;;  %1291 = vmatpush3.bf16.msra.mxu1 %v1455_v62 }
 0x11e   :  { %1260 = vmatprep.subr.bf16.mxu0 %v1448_v54  ;;  %1292 = vmatprep.subr.bf16.mxu1 %v1585_v59 }
 0x121   :  { %1261 = vmatpush3.bf16.msra.mxu0 %v1449_v55  ;;  %1293 = vmatpush3.bf16.msra.mxu1 %v1456_v63 }
 0x122   :  { %1262 = vmatprep.subr.bf16.mxu0 %v1450_v56  ;;  %1294 = vmatprep.subr.bf16.mxu1 %v1585_v59 }
 0x125   :  { %1263 = vmatpush3.bf16.msra.mxu0 %v1451_v57  ;;  %1295 = vmatpush3.bf16.msra.mxu1 %v1457_v13 }
 0x126   :  { %1304 = vmatprep.subr.bf16.mxu0 %v1585_v59  ;;  %1296 = vmatprep.subr.bf16.mxu1 %v1585_v59 }
 0x129   :  { %1297 = vmatpush3.bf16.msra.mxu1 %v1458_v14 }
 0x12a   :  { %1298 = vmatprep.subr.bf16.mxu1 %v1585_v59 }
 0x12d   :  { %1299 = vmatpush3.bf16.msra.mxu1 %v1459_v16 }
 0x1c8   :  { %v687_v1 = vpop.f32.mrf.mxu0 }
 0x1c9   :  { %v688_v7 = vadd.f32 %v687_v1, %v326_v3 }
 0x1ca   :  { %v689_v2 = vpop.f32.mrf.mxu0 }
 0x1cb   :  { %v690_v9 = vadd.f32 %v689_v2, %v330_v5 }
 0x1cc   :  { %v691_v4 = vpop.f32.mrf.mxu0 }
 0x1ce   :  { %v692_v6 = vpop.f32.mrf.mxu0 }
 0x1d0   :  { %v728_v8 = vpop.f32.mrf.mxu1 }
 0x1d1   :  { %v729_v10 = vadd.f32 %v728_v8, %v688_v7 }
 0x1d2   :  { %v730_v11 = vpop.f32.mrf.mxu1 }
 0x1d3   :  { %v731_v12 = vadd.f32 %v730_v11, %v690_v9  ;;  %v735_v15 = vmax.f32 %v729_v10, 0.0 }
 0x1d4   :  { %v732_v17 = vpop.f32.mrf.mxu1 }
 0x1d5   :  { %v736_v18 = vmax.f32 %v731_v12, 0.0  ;;  %v737_v21 = vpack.c.bf16 %v735_v15, %v735_v15 }
 0x1d6   :  { %v733_v19 = vpop.f32.mrf.mxu1 }
 0x1d7   :  { %v738_v20 = vpack.c.bf16 %v736_v18, %v736_v18 }
 0x1d9   :  { %906 = vmatprep.mubr.bf16.mxu0 %v738_v20 }
 0x1da   :  { %907 = vmatmul.mubr.bf16.vlgmr.msra.gmra.mxu0 %v737_v21 }
 0x1db   :  { %1312 = vmatprep.mubr.msk.bf16.mxu0 %vm1586_vm1, %v1585_v59  ;;  %1305 = vmatpush3.bf16.msra.mxu0 %v1460_v22 }
 0x1dc   :  { %1306 = vmatprep.subr.bf16.mxu0 %v1585_v59 }
 0x1df   :  { %1307 = vmatpush3.bf16.msra.mxu0 %v1461_v23 }
 0x1e0   :  { %1308 = vmatprep.subr.bf16.mxu0 %v1585_v59 }
 0x1e3   :  { %1309 = vmatpush3.bf16.msra.mxu0 %v1462_v33 }
 0x1e4   :  { %1310 = vmatprep.subr.bf16.mxu0 %v1585_v59 }
 0x1e7   :  { %1311 = vmatpush3.bf16.msra.mxu0 %v1463_v34 }
 0x29a   :  { %v1264_v24 = vpop.f32.mrf.mxu0 }
 0x29c   :  { %v1265_v26 = vpop.f32.mrf.mxu0 }
 0x29d   :  { %v1266_v27 = vadd.f32 %v1265_v26, %v1264_v24 }
 0x29e   :  { %v1267_v28 = vpop.f32.mrf.mxu0 }
 0x29f   :  { %v909_v29 = vadd.f32 %v1266_v27, %v1216_v25 }
 0x2a0   :  { %v1268_v30 = vpop.f32.mrf.mxu0 }
 0x2a1   :  { %v914_v31 = vmax.f32 %v909_v29, 0.0 }
 0x2a3   :  { %v915_v32 = vpack.c.bf16 %v914_v31, %v914_v31 }
 0x2a5   :  { %1301 = vmatmul.mubr.bf16.vlgmr.msra.gmra.mxu1 %v915_v32 }
 0x365   :  { %v1021_v36 = vpop.f32.mrf.mxu1 }
 0x366   :  { %v1022_v37 = vadd.f32 %v1233_v35, %v1021_v36 }
 0x367   :  { %v1302_v38 = vpop.f32.mrf.mxu1 }
 0x368   :  { %v1027_v39 = vmax.f32 %v1022_v37, 0.0 }
 0x369   :  { %v1024_v40 = vpop.f32.mrf.mxu1 }
 0x36a   :  { %v1028_v41 = vpack.c.bf16 %v1027_v39, %v1027_v39 }
 0x36b   :  { %v1303_v42 = vpop.f32.mrf.mxu1 }
 0x36c   :  { %1313 = vmatmul.mubr.msk.bf16.vlgmr.msra.gmra.mxu0 %vm1068_vm2, %v1028_v41 }
 0x42c   :  { %v1106_v44 = vpop.f32.mrf.mxu0 }
 0x42d   :  { %v1107_v45 = vadd.f32 %v1242_v43, %v1106_v44 }
 0x42e   :  { %v1314_v46 = vpop.f32.mrf.mxu0 }
 0x42f   :  { %v1113_v47 = vsel %vm1112_vm3, %v1107_v45, -inf }
 0x430   :  { %1114 = vmax.xlane.f32.xlu0 %v1113_v47  ;;  %v1109_v48 = vpop.f32.mrf.mxu0 }
 0x432   :  { %v1315_v49 = vpop.f32.mrf.mxu0 }
 0x4b9   :  { %v1115_v50 = vpop.xlane.xlu0 %1114 }
 0x4ba   :  { %v1116_v51 = vsub.f32 %v1107_v45, %v1115_v50 }
 0x4bc   :  { %v1117_v52 = vmul.f32 1.442695, %v1116_v51 }
 0x4be   :  { %1464 = vpow2.f32 %v1117_v52 }
 0x4cb   :  { %v1465_v53 = vpop.eup %1464 }
 0x4cc   :  { %v1119_v54 = vsel %vm1112_vm3, %v1465_v53, 0.0 }
 0x4cd   :  { %1120 = vadd.xlane.f32.xlu0 %v1119_v54 }
 0x556   :  { %v1121_v55 = vpop.xlane.xlu0 %1120 }
 0x557   :  { %1466 = vrcp.f32 %v1121_v55 }
 0x564   :  { %v1467_v56 = vpop.eup %1466 }
 0x565   :  { %v1123_v57 = vmul.f32 %v1467_v56, %v1465_v53 }
 0x567   :  { %1124 = vst.msk [vmem:[#allocation10] sm:$0xff] %vm1112_vm3, %v1123_v57 }
 0x568   :  { %1559 = shalt.err (!%p1556_p10)
}
 0x569   :  { %1134 = dma.vmem_to_hbm [thread:$0]  %s1132_s9, 128, %s1803_s11, [#allocation4]  }
 0x56a   :  { %1574 = dma.done.wait [#allocation4], 128  }
 0x56b   :  { %1575 = vsyncadd [#allocation4], 4294967168 }
 0x56c   :  { %1138 = vsyncpa [#allocation3], 1 }
 0x56d   :  { %1139 = vsyncpa [#allocation6], 1 }
 0x56e   :  { %1140 = vsyncpa [#allocation9], 1 }
 0x56f   :  { %1141 = vsyncpa [#allocation4], 1 }

</bundles_post_ra>
